<compile_context>
chip_gen: v5e
topology: v5e:2x2
jax: 0.10.0
libtpu: 0.0.40
codegen_flags: <defaults>
</compile_context>

<pallas_src>
import functools

import jax
import jax.numpy as jnp
from jax.experimental import pallas as pl
from jax.experimental.pallas import tpu as pltpu


def _classifier_kernel(x_ref, w_ref, b_ref, feat_ref, out_ref, *, e, e_pad, c, cdt):
    # x_ref:    (4E, tt)      channels-first time tile (native NCT layout)
    # w_ref:    (R, 4E)       concatenated [W_fuse ; pad ; W_pred@W_fuse], VMEM-resident
    # b_ref:    (R, 1)        concatenated [b_fuse ; pad ; W_pred@b_fuse + b_pred]
    # feat_ref: (E, tt)       -> (B, E, T) output, lane-dense along T
    # out_ref:  (C, tt)       -> (B, C, T) output, lane-dense along T
    x = x_ref[...]
    if cdt is not None and x.dtype != cdt:
        x = x.astype(cdt)  # per-tile MXU-operand cast only; never a wrapper HBM pass

    # One MXU pass over x for both heads; f32 accumulation.
    y = jnp.dot(w_ref[...], x, preferred_element_type=jnp.float32) + b_ref[...]

    # TODO(synk): nn.Dropout() in training mode would mask feat here (p=0.5) via
    #             pltpu.prng_seed / prng_random_bits; the pre-fused logits path is
    #             only valid because eval-mode dropout is the identity.
    feat_ref[...] = y[:e].astype(feat_ref.dtype)
    out_ref[...] = y[e_pad:e_pad + c].astype(out_ref.dtype)   # e_pad is 8-aligned


def classifier_forward(concat_feature, w_fuse, b_fuse, w_pred, b_pred,
                       *, tile_t=8192, vmem_budget_bytes=24 * 1024 * 1024,
                       compute_dtype=None):
    """concat_feature: (B, 4E, T)
       w_fuse: (E, 4E, 1), b_fuse: (E,)   -- Conv1d(4E -> E, k=1) params
       w_pred: (C, E, 1),  b_pred: (C,)   -- Conv1d(E -> C, k=1) params
       Returns (logits (B, T, C), feat (B, E, T)) -- same as the PyTorch module."""
    B, C_in, T = concat_feature.shape
    E = w_fuse.shape[0]
    C = w_pred.shape[0]
    assert C_in == 4 * E

    out_dtype = concat_feature.dtype
    x_dtype = concat_feature.dtype
    cdt = compute_dtype

    # --- weight prep (tiny, done once in the wrapper) -------------------------
    w1 = w_fuse[:, :, 0].astype(jnp.float32)                    # (E, 4E)
    w2 = w_pred[:, :, 0].astype(jnp.float32)                    # (C, E)
    b1 = b_fuse.reshape(E, 1).astype(jnp.float32)               # (E, 1)
    # Fuse the second 1x1 conv into the first (dropout identity in eval mode):
    #   logits = W2 (W1 x + b1) + b2 = (W2 W1) x + (W2 b1 + b2)
    wf = w2 @ w1                                                 # (C, 4E)
    bf = w2 @ b1 + b_pred.reshape(C, 1).astype(jnp.float32)      # (C, 1)

    # Concatenate into one (R, 4E) weight so x hits the MXU once.  Pad the feat
    # rows up to a multiple of 8 so the logits slice starts sublane-aligned
    # (the matmul result y is f32 -> 8 rows per sublane tile).
    E_pad = ((E + 7) // 8) * 8
    R = E_pad + C
    w_cat = jnp.zeros((R, C_in), jnp.float32)
    w_cat = w_cat.at[:E].set(w1).at[E_pad:].set(wf)
    b_cat = jnp.zeros((R, 1), jnp.float32)
    b_cat = b_cat.at[:E].set(b1).at[E_pad:].set(bf)

    w_dtype = x_dtype if cdt is None else cdt
    w_cat = w_cat.astype(w_dtype)

    # --- VMEM-budget-aware, balanced time tiling ------------------------------
    x_item = jnp.dtype(x_dtype).itemsize
    o_item = jnp.dtype(out_dtype).itemsize
    w_bytes = R * C_in * jnp.dtype(w_dtype).itemsize + R * 4
    per_col = C_in * x_item + (E + C) * o_item           # bytes per time column (1 buf)
    avail = max(0, int(vmem_budget_bytes) - 2 * w_bytes)
    tt_budget = max(128, avail // (2 * per_col))          # double-buffered
    tt_max = max(128, (min(int(tile_t), int(tt_budget)) // 128) * 128)

    if T <= tt_max:
        tt, nt = T, 1
    else:
        nt = pl.cdiv(T, tt_max)
        tt = ((pl.cdiv(T, nt) + 127) // 128) * 128        # balanced, lane-aligned
        nt = pl.cdiv(T, tt)

    # Guarantee >= 2 grid blocks for small-batch calls so v7x's 2 TensorCores
    # both get work (only possible when T has at least two 128-lane tiles).
    if B * nt < 2 and T >= 256:
        tt = ((pl.cdiv(T, 2) + 127) // 128) * 128
        nt = pl.cdiv(T, tt)

    grid = (B, nt)

    vmem_limit = int(min(max(2 * per_col * tt + 2 * w_bytes + (4 << 20), 20 << 20),
                         60 << 20))

    flops = 2 * R * C_in * T * B
    bytes_accessed = B * T * (C_in * x_item + (E + C) * o_item) + w_bytes

    kernel = functools.partial(_classifier_kernel, e=E, e_pad=E_pad, c=C, cdt=cdt)

    feat, logits_ct = pl.pallas_call(
        kernel,
        out_shape=(
            jax.ShapeDtypeStruct((B, E, T), out_dtype),   # feat, already (B, E, T)
            jax.ShapeDtypeStruct((B, C, T), out_dtype),   # logits, channels-first
        ),
        grid=grid,
        in_specs=[
            pl.BlockSpec((None, C_in, tt), lambda b, t: (b, 0, t)),  # x tile
            pl.BlockSpec((R, C_in), lambda b, t: (0, 0)),            # W_cat (resident)
            pl.BlockSpec((R, 1), lambda b, t: (0, 0)),               # b_cat (resident)
        ],
        out_specs=(
            pl.BlockSpec((None, E, tt), lambda b, t: (b, 0, t)),
            pl.BlockSpec((None, C, tt), lambda b, t: (b, 0, t)),
        ),
        compiler_params=pltpu.CompilerParams(
            dimension_semantics=("parallel", "parallel"),
            vmem_limit_bytes=vmem_limit),
        cost_estimate=pl.CostEstimate(
            flops=int(flops), transcendentals=0, bytes_accessed=int(bytes_accessed)),
    )(concat_feature, w_cat, b_cat)

    # Only remaining wrapper-side layout op: permute the tiny (B, C, T) logits
    # to the module's (B, T, C) return layout.
    logits = jnp.transpose(logits_ct, (0, 2, 1))
    return logits, feat


def _reference(concat_feature, w_fuse, b_fuse, w_pred, b_pred):
    # Pure-JAX reference of the PyTorch forward (eval mode), unfused chain.
    x = jnp.einsum("bct,oc->bot", concat_feature, w_fuse[:, :, 0]) + b_fuse[None, :, None]
    feat = x
    y = jnp.einsum("bct,oc->bot", feat, w_pred[:, :, 0]) + b_pred[None, :, None]
    return jnp.transpose(y, (0, 2, 1)), feat


if __name__ == "__main__":
    key = jax.random.PRNGKey(0)
    B, E, T, num_classes = 2, 32, 8, 8
    k1, k2, k3, k4, k5 = jax.random.split(key, 5)

    concat_feature = jax.random.normal(k1, (B, 4 * E, T), dtype=jnp.float32)
    w_fuse = jax.random.normal(k2, (E, 4 * E, 1), dtype=jnp.float32) * 0.05
    b_fuse = jax.random.normal(k3, (E,), dtype=jnp.float32) * 0.05
    w_pred = jax.random.normal(k4, (num_classes, E, 1), dtype=jnp.float32) * 0.05
    b_pred = jax.random.normal(k5, (num_classes,), dtype=jnp.float32) * 0.05

    logits, feat = classifier_forward(concat_feature, w_fuse, b_fuse, w_pred, b_pred)
    jax.block_until_ready((logits, feat))

    ref_logits, ref_feat = _reference(concat_feature, w_fuse, b_fuse, w_pred, b_pred)
    assert logits.shape == (B, T, num_classes)
    assert feat.shape == (B, E, T)
    assert jnp.allclose(logits, ref_logits, atol=1e-4, rtol=1e-4)
    assert jnp.allclose(feat, ref_feat, atol=1e-4, rtol=1e-4)

    print("KERNEL_OK")
</pallas_src>

<mosaic_0001>
module attributes {stable_mosaic.version = 11 : i64} {
  func.func @_classifier_kernel(%arg0: i32, %arg1: i32, %arg2: memref<1x128x8xf32, #tpu.memory_space<vmem>>, %arg3: memref<40x128xf32, #tpu.memory_space<vmem>>, %arg4: memref<40x1xf32, #tpu.memory_space<vmem>>, %arg5: memref<1x32x8xf32, #tpu.memory_space<vmem>>, %arg6: memref<1x8x8xf32, #tpu.memory_space<vmem>>) attributes {dimension_semantics = [#tpu.dimension_semantics<parallel>, #tpu.dimension_semantics<parallel>], iteration_bounds = array<i64: 2, 1>, scalar_prefetch = 0 : i64, scratch_operands = 0 : i64, tpu.core_type = #tpu.core_type<tc>, window_params = [{transform_indices = @transform_0, window_bounds = array<i64: 1, 128, 8>}, {pipeline_mode = #tpu.pipeline_mode<synchronous>, transform_indices = @transform_1, window_bounds = array<i64: 40, 128>}, {pipeline_mode = #tpu.pipeline_mode<synchronous>, transform_indices = @transform_2, window_bounds = array<i64: 40, 1>}, {transform_indices = @transform_3, window_bounds = array<i64: 1, 32, 8>}, {transform_indices = @transform_4, window_bounds = array<i64: 1, 8, 8>}]} {
    %c0 = arith.constant 0 : index
    %c0_0 = arith.constant 0 : index
    %c0_1 = arith.constant 0 : index
    %0 = vector.load %arg2[%c0, %c0_0, %c0_1] : memref<1x128x8xf32, #tpu.memory_space<vmem>>, vector<1x128x8xf32>
    %1 = vector.shape_cast %0 : vector<1x128x8xf32> to vector<128x8xf32>
    %c0_2 = arith.constant 0 : index
    %c0_3 = arith.constant 0 : index
    %2 = vector.load %arg3[%c0_2, %c0_3] : memref<40x128xf32, #tpu.memory_space<vmem>>, vector<40x128xf32>
    %cst = arith.constant dense<0.000000e+00> : vector<40x8xf32>
    %3 = tpu.matmul %2, %1, %cst {dimension_numbers = #tpu.dot_dimension_numbers<[1], [0], [0], [1], [0, 0, 1, 1], [], []>} : vector<40x128xf32>, vector<128x8xf32>, vector<40x8xf32> -> vector<40x8xf32>
    %c0_4 = arith.constant 0 : index
    %c0_5 = arith.constant 0 : index
    %4 = vector.load %arg4[%c0_4, %c0_5] : memref<40x1xf32, #tpu.memory_space<vmem>>, vector<40x1xf32>
    %5 = vector.broadcast %4 : vector<40x1xf32> to vector<40x8xf32>
    %6 = arith.addf %3, %5 : vector<40x8xf32>
    %7 = vector.extract_strided_slice %6 {offsets = [0, 0], sizes = [32, 8], strides = [1, 1]} : vector<40x8xf32> to vector<32x8xf32>
    %c0_6 = arith.constant 0 : index
    %c0_7 = arith.constant 0 : index
    %c0_8 = arith.constant 0 : index
    %8 = vector.load %arg5[%c0_6, %c0_7, %c0_8] : memref<1x32x8xf32, #tpu.memory_space<vmem>>, vector<1x32x8xf32>
    %9 = vector.shape_cast %8 : vector<1x32x8xf32> to vector<32x8xf32>
    %10 = vector.shape_cast %7 : vector<32x8xf32> to vector<1x32x8xf32>
    tpu.vector_store %arg5[%c0_6, %c0_7, %c0_8], %10 {strides = array<i32>} : memref<1x32x8xf32, #tpu.memory_space<vmem>>, vector<1x32x8xf32>,
    %11 = vector.extract_strided_slice %6 {offsets = [32, 0], sizes = [8, 8], strides = [1, 1]} : vector<40x8xf32> to vector<8x8xf32>
    %c0_9 = arith.constant 0 : index
    %c0_10 = arith.constant 0 : index
    %c0_11 = arith.constant 0 : index
    %12 = vector.load %arg6[%c0_9, %c0_10, %c0_11] : memref<1x8x8xf32, #tpu.memory_space<vmem>>, vector<1x8x8xf32>
    %13 = vector.shape_cast %12 : vector<1x8x8xf32> to vector<8x8xf32>
    %14 = vector.shape_cast %11 : vector<8x8xf32> to vector<1x8x8xf32>
    tpu.vector_store %arg6[%c0_9, %c0_10, %c0_11], %14 {strides = array<i32>} : memref<1x8x8xf32, #tpu.memory_space<vmem>>, vector<1x8x8xf32>,
    return
  }
  func.func @transform_0(%arg0: i32, %arg1: i32) -> (i32, i32, i32) {
    %c0_i32 = arith.constant 0 : i32
    %c0_i32_0 = arith.constant 0 : i32
    return %arg0, %c0_i32, %arg1 : i32, i32, i32
  }
  func.func @transform_1(%arg0: i32, %arg1: i32) -> (i32, i32) {
    %c0_i32 = arith.constant 0 : i32
    %c0_i32_0 = arith.constant 0 : i32
    %c0_i32_1 = arith.constant 0 : i32
    return %c0_i32, %c0_i32_0 : i32, i32
  }
  func.func @transform_2(%arg0: i32, %arg1: i32) -> (i32, i32) {
    %c0_i32 = arith.constant 0 : i32
    %c0_i32_0 = arith.constant 0 : i32
    %c0_i32_1 = arith.constant 0 : i32
    return %c0_i32, %c0_i32_0 : i32, i32
  }
  func.func @transform_3(%arg0: i32, %arg1: i32) -> (i32, i32, i32) {
    %c0_i32 = arith.constant 0 : i32
    %c0_i32_0 = arith.constant 0 : i32
    return %arg0, %c0_i32, %arg1 : i32, i32, i32
  }
  func.func @transform_4(%arg0: i32, %arg1: i32) -> (i32, i32, i32) {
    %c0_i32 = arith.constant 0 : i32
    %c0_i32_0 = arith.constant 0 : i32
    return %arg0, %c0_i32, %arg1 : i32, i32, i32
  }
}

</mosaic_0001>

<bundles_post_ra>
// kernel: tpu_custom_call.1
= control target key start
LH: loop header
LB: loop body
LE: loop exit
PB: predicated region body
PF: predicated region fallthrough
CT: control target
= control target key end

     0   :  { %10 = vsyncpa [#allocation3], 0  ;;  %s855_s0 = inlined_call_operand.vmem [shape: f32[2,128,8], index: 0, kind: input, shape index: {}]   ;;  %s856_s1 = inlined_call_operand.vmem [shape: f32[40,128], index: 1, kind: input, shape index: {}]   ;;  %s857_s2 = inlined_call_operand.vmem [shape: f32[40,1], index: 2, kind: input, shape index: {}]   ;;  %s858_s3 = inlined_call_operand.vmem [shape: f32[2,32,8], index: 3, kind: output, shape index: {0}]   ;;  %s859_s4 = inlined_call_operand.hbm [shape: f32[2,8,8], index: 4, kind: output, shape index: {1}]  }
   0x1   :  { %12 = vsyncpa [#allocation3 + $0x1], 0  ;;  %s698_s15 = smov 0   ;;  %s700_s16 = smov 0  }
   0x2   :  { %s702_s17 = smov 0   ;;  %s704_s18 = smov 0  }
   0x3   :  { %s706_s19 = smov 0   ;;  %s708_s20 = smov 0  }
   0x4 LB: > { %s469_s21 = sadd.s32 4294967295, %s670_s20   ;;  %s470_s22 = sadd.s32 4294967294, %s670_s20   ;;  %s670_s20 = sphi %s708_s20, %s18_s20   ;;  %s666_s19 = sphi %s706_s19, %s866_s19   ;;  %s662_s18 = sphi %s704_s18, %s865_s18   ;;  %s658_s17 = sphi %s702_s17, %s864_s17   ;;  %s654_s16 = sphi %s700_s16, %s863_s16   ;;  %s650_s15 = sphi %s698_s15, %s862_s15  }
   0x5   : > { %s30_s23 = sadd.s32 1, %s666_s19  ;;  %s137_s24 = sadd.s32 1, %s658_s17 }
   0x6   : > { %p32_p0 = scmp.ge.s32.totalorder %s30_s23, 2  ;;  %p147_p1 = scmp.ne.s32.totalorder %s658_s17, %s654_s16 }
   0x7   : > { %p148_p2 = scmp.eq.s32.totalorder %s469_s21, 1  ;;  %p153_p3 = scmp.ne.s32.totalorder %s654_s16, %s650_s15 }
   0x8   : > { %s868_s23 = smov (%p32_p0, %s30_s23), 0  ;;  %p154_p5 = scmp.eq.s32.totalorder %s470_s22, 1 }
   0x9   : > { %p738_p4 = por %p148_p2, %p147_p1  ;;  %s132_s26 = ssub.s32 %s666_s19, %s868_s23 }
   0xa   : > { %p473_p6 = scmp.ge.s32.totalorder %s670_s20, 1  ;;  %p135_p7 = scmp.eq.s32.totalorder %s132_s26, 0 }
   0xb   : > { %p745_p8 = por %p154_p5, %p153_p3  ;;  %p189_p9 = scmp.lt.s32.totalorder %s670_s20, 3 }
   0xc   : > { %s751_s28 = scalar_select %p135_p7, %s658_s17, %s137_s24  }
   0xd   : > { %p190_p10 = pnand %p473_p6, %p189_p9 }
   0xe   : > { %p226_p11 = scmp.lt.s32.totalorder (!%p190_p10), %s662_s18, 1  ;;  %s223_s24 = sand.u32 (!%p190_p10), 1, %s654_s16  }
   0xf   : > { %193 = sbr.rel (%p190_p10) target bundleno = 201 (0xc9), region = 32  ;;  %s480_s26 = sshll.u32 (!%p190_p10), %s662_s18, 3 }
  0x10   : > { %s354_s6 = scalar_lea.hbm (!%p190_p10), %s859_s4, %s480_s26  ;;  %s612_s14 = scalar_lea.hbm (!%p190_p10), %s859_s4, 16 }
  0x11   : > { %s358_s9 = sshll.u32 (!%p190_p10), %s354_s6, 4  ;;  %s359_s9 = int_to_ptr.hbm [resolvable:$true] %s358_s9 }
  0x12   : > { %s606_s10 = sshra.s32 (!%p190_p10), %s359_s9, 4  ;;  %s607_s10 = int_to_ptr.hbm [resolvable:$true] %s606_s10 }
  0x13   : > { %s608_s11 = scalar_lea.hbm (!%p190_p10), %s607_s10, 8  ;;  %p613_p1 = scmp.lt.s32.totalorder (!%p190_p10), %s607_s10, %s859_s4 }
  0x14   : > { %s755_s29 = scalar_select %p226_p11, %s662_s18, 1  ;;  %v261_v16 = vld [vmem:[%s856_s1 + $0x18] sm:$0xff]  ;;  %v260_v17 = vld [vmem:[%s856_s1 + $0x10] sm:$0xff]  ;;  %v258_v18 = vld [vmem:[%s856_s1] sm:$0xff]  ;;  %v672_v22 = vmov 0   ;;  %vm325_vm0 = vcmask 64512  }
  0x15   : > { %v259_v19 = vld [vmem:[%s856_s1 + $0x8] sm:$0xff]  ;;  %v267_v20 = vld [vmem:[%s857_s2 + $0x20] sm:$0xff]  ;;  %590 = vset.pattern.permute.xlu1 %v672_v22  ;;  %589 = vset.pattern.permute.xlu0 %v672_v22  ;;  %v266_v23 = vld [vmem:[%s857_s2 + $0x18] sm:$0xff]  ;;  %s340_s18 = scalar_lea.sflag [#allocation3], %s223_s24  ;;  %p609_p12 = scmp.ne.s32.totalorder %s607_s10, %s608_s11 }
  0x16   : > { %s483_s30 = sshll.u32 %s755_s29, 7  ;;  %v264_v21 = vld [vmem:[%s857_s2 + $0x8] sm:$0xff]  ;;  %290 = vperm.xlu0 %589, %v267_v20   ;;  %v262_v24 = vld [vmem:[%s856_s1 + $0x20] sm:$0xff]  ;;  %591 = vset.pattern.permute.xlu2 %v672_v22  ;;  %v265_v25 = vld [vmem:[%s857_s2 + $0x10] sm:$0xff]  ;;  %s484_s13 = sshll.u32 %s755_s29, 5 }
  0x17   : > { %s761_s7 = scalar_lea.vmem %s855_s0, %s483_s30  ;;  %275 = vperm.xlu1 %590, %v264_v21   ;;  %285 = vperm.xlu2 %591, %v266_v23   ;;  %v263_v26 = vld [vmem:[%s857_s2] sm:$0xff]  ;;  %s241_s22 = scalar_lea.vmem %s858_s3, %s484_s13 }
  0x18   : > { %v257_v0 = vld [vmem:[%s761_s7 + $0x78] sm:$0xff]  ;;  %v256_v1 = vld [vmem:[%s761_s7 + $0x70] sm:$0xff]  ;;  %v255_v2 = vld [vmem:[%s761_s7 + $0x68] sm:$0xff]  ;;  %s474_s29 = sshll.u32 %s223_s24, 3  ;;  %p610_p13 = pnand %p609_p12, %p738_p4 }
  0x19   : > { %487 = vmatpush.msra.mxu3 %v257_v0  ;;  %486 = vmatpush.msra.mxu2 %v257_v0  ;;  %v254_v3 = vld [vmem:[%s761_s7 + $0x60] sm:$0xff]  ;;  %v253_v4 = vld [vmem:[%s761_s7 + $0x58] sm:$0xff]  ;;  %v252_v5 = vld [vmem:[%s761_s7 + $0x50] sm:$0xff]  ;;  %p614_p2 = scmp.lt.s32.totalorder %s612_s14, %s608_s11 }
  0x1a   : > { %293 = vmatpush.msra.mxu0 %v257_v0  ;;  %485 = vmatpush.msra.mxu1 %v257_v0  ;;  %v251_v6 = vld [vmem:[%s761_s7 + $0x48] sm:$0xff]  ;;  %v250_v7 = vld [vmem:[%s761_s7 + $0x40] sm:$0xff]  ;;  %v249_v8 = vld [vmem:[%s761_s7 + $0x38] sm:$0xff]  ;;  %p611_p0 = pneg %p610_p13 }
  0x1b   : > { %490 = vmatpush.msra.mxu3 %v256_v1  ;;  %489 = vmatpush.msra.mxu2 %v256_v1  ;;  %v248_v9 = vld [vmem:[%s761_s7 + $0x30] sm:$0xff]  ;;  %v247_v10 = vld [vmem:[%s761_s7 + $0x28] sm:$0xff]  ;;  %v246_v11 = vld [vmem:[%s761_s7 + $0x20] sm:$0xff]  ;;  %p615_p3 = por %p614_p2, %p613_p1 }
  0x1c   : > { %294 = vmatpush.msra.mxu0 %v256_v1  ;;  %488 = vmatpush.msra.mxu1 %v256_v1  ;;  %v245_v12 = vld [vmem:[%s761_s7 + $0x18] sm:$0xff]  ;;  %v244_v13 = vld [vmem:[%s761_s7 + $0x10] sm:$0xff]  ;;  %v243_v14 = vld [vmem:[%s761_s7 + $0x8] sm:$0xff] }
  0x1d   : > { %493 = vmatpush.msra.mxu3 %v255_v2  ;;  %492 = vmatpush.msra.mxu2 %v255_v2  ;;  %v242_v15 = vld [vmem:[%s761_s7] sm:$0xff]  ;;  %s225_s7 = scalar_lea.vmem [#allocation2], %s474_s29  ;;  %p616_p5 = pnand %p615_p3, %p611_p0 }
  0x1e   : > { %295 = vmatpush.msra.mxu0 %v255_v2  ;;  %491 = vmatpush.msra.mxu1 %v255_v2  ;;  %s356_s8 = sshll.u32 %s225_s7, 4  ;;  %s357_s8 = int_to_ptr.vmem [resolvable:$true] %s356_s8 }
  0x1f   : > { %496 = vmatpush.msra.mxu3 %v254_v3  ;;  %495 = vmatpush.msra.mxu2 %v254_v3 }
  0x20   : > { %296 = vmatpush.msra.mxu0 %v254_v3  ;;  %494 = vmatpush.msra.mxu1 %v254_v3 }
  0x21   : > { %499 = vmatpush.msra.mxu3 %v253_v4  ;;  %498 = vmatpush.msra.mxu2 %v253_v4 }
  0x22   : > { %297 = vmatpush.msra.mxu0 %v253_v4  ;;  %497 = vmatpush.msra.mxu1 %v253_v4 }
  0x23   : > { %502 = vmatpush.msra.mxu3 %v252_v5  ;;  %501 = vmatpush.msra.mxu2 %v252_v5 }
  0x24   : > { %298 = vmatpush.msra.mxu0 %v252_v5  ;;  %500 = vmatpush.msra.mxu1 %v252_v5 }
  0x25   : > { %505 = vmatpush.msra.mxu3 %v251_v6  ;;  %504 = vmatpush.msra.mxu2 %v251_v6 }
  0x26   : > { %299 = vmatpush.msra.mxu0 %v251_v6  ;;  %503 = vmatpush.msra.mxu1 %v251_v6 }
  0x27   : > { %508 = vmatpush.msra.mxu3 %v250_v7  ;;  %507 = vmatpush.msra.mxu2 %v250_v7 }
  0x28   : > { %300 = vmatpush.msra.mxu0 %v250_v7  ;;  %506 = vmatpush.msra.mxu1 %v250_v7 }
  0x29   : > { %511 = vmatpush.msra.mxu3 %v249_v8  ;;  %510 = vmatpush.msra.mxu2 %v249_v8 }
  0x2a   : > { %301 = vmatpush.msra.mxu0 %v249_v8  ;;  %509 = vmatpush.msra.mxu1 %v249_v8 }
  0x2b   : > { %514 = vmatpush.msra.mxu3 %v248_v9  ;;  %513 = vmatpush.msra.mxu2 %v248_v9 }
  0x2c   : > { %302 = vmatpush.msra.mxu0 %v248_v9  ;;  %512 = vmatpush.msra.mxu1 %v248_v9 }
  0x2d   : > { %517 = vmatpush.msra.mxu3 %v247_v10  ;;  %516 = vmatpush.msra.mxu2 %v247_v10 }
  0x2e   : > { %303 = vmatpush.msra.mxu0 %v247_v10  ;;  %515 = vmatpush.msra.mxu1 %v247_v10 }
  0x2f   : > { %520 = vmatpush.msra.mxu3 %v246_v11  ;;  %519 = vmatpush.msra.mxu2 %v246_v11 }
  0x30   : > { %304 = vmatpush.msra.mxu0 %v246_v11  ;;  %518 = vmatpush.msra.mxu1 %v246_v11 }
  0x31   : > { %523 = vmatpush.msra.mxu3 %v245_v12  ;;  %522 = vmatpush.msra.mxu2 %v245_v12 }
  0x32   : > { %305 = vmatpush.msra.mxu0 %v245_v12  ;;  %521 = vmatpush.msra.mxu1 %v245_v12 }
  0x33   : > { %526 = vmatpush.msra.mxu3 %v244_v13  ;;  %525 = vmatpush.msra.mxu2 %v244_v13 }
  0x34   : > { %306 = vmatpush.msra.mxu0 %v244_v13  ;;  %524 = vmatpush.msra.mxu1 %v244_v13 }
  0x35   : > { %529 = vmatpush.msra.mxu3 %v243_v14  ;;  %528 = vmatpush.msra.mxu2 %v243_v14 }
  0x36   : > { %307 = vmatpush.msra.mxu0 %v243_v14  ;;  %527 = vmatpush.msra.mxu1 %v243_v14 }
  0x37   : > { %532 = vmatpush.msra.mxu3 %v242_v15  ;;  %531 = vmatpush.msra.mxu2 %v242_v15 }
  0x38   : > { %318 = vmatmul.f32.vlgmr.msra.gmra.mxu3 %v261_v16  ;;  %315 = vmatmul.f32.vlgmr.msra.gmra.mxu2 %v260_v17 }
  0x39   : > { %308 = vmatpush.msra.mxu0 %v242_v15  ;;  %530 = vmatpush.msra.mxu1 %v242_v15 }
  0x3a   : > { %309 = vmatmul.f32.vlgmr.msra.gmra.mxu0 %v258_v18  ;;  %312 = vmatmul.f32.vlgmr.msra.gmra.mxu1 %v259_v19 }
  0x3b   : > { %280 = vperm.xlu1 %590, %v265_v25   ;;  %270 = vperm.xlu0 %589, %v263_v26  }
  0x40   : > { %321 = vmatmul.f32.gmra.mxu3 %v262_v24 }
  0x71   : > { %v286_v34 = vpop.permute.xlu2 %285 }
  0x88   : > { %v291_v27 = vpop.permute.xlu0 %290 }
  0x89   : > { %v276_v28 = vpop.permute.xlu1 %275 }
  0xad   : > { %v271_v29 = vpop.permute.xlu0 %270  ;;  %v281_v35 = vpop.permute.xlu1 %280 }
  0xb7   : > { %v310_v30 = vpop.f32.mrf.mxu0  ;;  %v313_v31 = vpop.f32.mrf.mxu1 }
  0xb8   : > { %v311_v32 = vadd.f32 %v310_v30, %v271_v29  ;;  %v314_v33 = vadd.f32 %v313_v31, %v276_v28 }
  0xba   : > { %326 = vst.msk [vmem:[%s241_s22] sm:$0xff] %vm325_vm0, %v311_v32 }
  0xbb   : > { %v319_v36 = vpop.f32.mrf.mxu3  ;;  %327 = vst.msk [vmem:[%s241_s22 + $0x8] sm:$0xff] %vm325_vm0, %v314_v33  ;;  %v316_v37 = vpop.f32.mrf.mxu2 }
  0xbc   : > { %v320_v38 = vadd.f32 %v319_v36, %v286_v34  ;;  %v317_v39 = vadd.f32 %v316_v37, %v281_v35 }
  0xbe   : > { %329 = vst.msk [vmem:[%s241_s22 + $0x18] sm:$0xff] %vm325_vm0, %v320_v38 }
  0xbf   : > { %328 = vst.msk [vmem:[%s241_s22 + $0x10] sm:$0xff] %vm325_vm0, %v317_v39 }
  0xc3   : > { %v322_v40 = vpop.f32.mrf.mxu3 }
  0xc4   : > { %v323_v41 = vadd.f32 %v322_v40, %v291_v27 }
  0xc6   : > { %330 = vst.msk [vmem:[%s225_s7] sm:$0xff] %vm325_vm0, %v323_v41 }
  0xc7   : > { %619 = shalt.err (!%p616_p5)
}
  0xc8   : > { %533 = dma.vmem_to_hbm [thread:$0]  (%p738_p4), %s357_s8, 128, %s359_s9, %s340_s18  }
  0xc9 PF: > { %p539_p6 = scmp.ge.s32.totalorder %s670_s20, 2  ;;  %s381_s24 = sand.u32 1, %s650_s15  }
  0xca   : > { %s382_s29 = scalar_lea.sflag [#allocation3], %s381_s24 }
  0xcb   : > { %p536_p7 = pnand %p539_p6, %p745_p8 }
  0xcd   : > { %p537_p9 = pneg %p536_p7 }
  0xcf   : > { %645 = dma.done.wait (%p537_p9), %s382_s29, 128  }
  0xd0   : > { %647 = vsyncadd (%p537_p9), %s382_s29, 4294967168  ;;  %s18_s20 = sadd.s32 1, %s670_s20   ;;  %s862_s15 = smov %s654_s16 }
  0xd1   : > { %p15_p10 = scmp.ge.s32.totalorder %s18_s20, 4   ;;  %s863_s16 = smov %s658_s17 }
  0xd2   : > { %s864_s17 = smov %s751_s28  ;;  %s865_s18 = smov %s666_s19 }
  0xd3   : > { %s866_s19 = smov %s868_s23  ;;  %17 = sbr.rel (!%p15_p10) target bundleno = 4 (0x4), region = 79 }
  0xd8   :  { %388 = vsyncpa [#allocation3], 1 }
  0xd9   :  { %390 = vsyncpa [#allocation3 + $0x1], 1 }

</bundles_post_ra>
